<compile_context>
chip_gen: v5e
topology: v5e:2x2
jax: 0.10.0
libtpu: 0.0.40
codegen_flags: <defaults>
</compile_context>

<pallas_src>
import functools

import jax
import jax.numpy as jnp
from jax.experimental import pallas as pl
from jax.experimental.pallas import tpu as pltpu

EPS = 1e-5


# ----------------------------- Pallas kernels --------------------------------

def _aspp_fused_taps_kernel(x_ref, wt_ref, bbr_ref, wpm_ref, pbias_ref, o_ref, *, H, W):
    """Fused ASPP for one batch image; 3x3 taps built in VMEM (no im2col in HBM).

    x_ref:     (C, P)      flattened input, pixels on the lane axis (P >= H*W)
    wt_ref:    (9, 4C, C)  per-tap branch weights (BN folded; tap 4 carries the 1x1
                           branch-0 weight; 3x3 branches 1-3 all use dilation 1)
    bbr_ref:   (4C, 1)     branch BN biases
    wpm_ref:   (C, 4C)     projection weight for the 4 conv branches (BN folded)
    pbias_ref: (C, 1)      per-batch constant = proj(pooled branch) + proj BN bias
    o_ref:     (C, P)      output tile (lane dense)
    """
    x = x_ref[...]
    P = x.shape[1]
    C4 = bbr_ref.shape[0]

    # Output-pixel coordinates, for boundary masks of the shifted taps.
    pos = jax.lax.broadcasted_iota(jnp.int32, (1, P), 1)
    row = pos // W
    col = pos % W
    row_ok = {-1: row >= 1, 0: None, 1: row <= H - 2}
    col_ok = {-1: col >= 1, 0: None, 1: col <= W - 2}

    acc = jnp.zeros((C4, P), jnp.float32)
    for t in range(9):
        ky, kx = divmod(t, 3)
        dy, dx = ky - 1, kx - 1
        # tap[p] = x[p + dy*W + dx]  (static lane rotation; out-of-image sources --
        # including the wrapped lanes -- are zeroed by the masks below).
        m = (dy * W + dx) % P
        xt = x if m == 0 else jnp.concatenate([x[:, m:], x[:, :m]], axis=1)
        cond = row_ok[dy]
        if col_ok[dx] is not None:
            cond = col_ok[dx] if cond is None else jnp.logical_and(cond, col_ok[dx])
        if cond is not None:
            xt = xt * cond.astype(xt.dtype)
        acc = acc + jnp.dot(wt_ref[t], xt, preferred_element_type=jnp.float32)

    br = jnp.maximum(acc + bbr_ref[...], 0.0)
    out = jnp.dot(wpm_ref[...], br.astype(wpm_ref.dtype),
                  preferred_element_type=jnp.float32)
    out = jnp.maximum(out + pbias_ref[...], 0.0)
    o_ref[...] = out.astype(o_ref.dtype)


def _aspp_patches_kernel(patches_ref, wbr_ref, bbr_ref, wpm_ref, pbias_ref, o_ref):
    """Compatibility path (previous, validated design): wrapper-materialized im2col."""
    br = jnp.dot(wbr_ref[...], patches_ref[...], preferred_element_type=jnp.float32)
    br = jnp.maximum(br + bbr_ref[...], 0.0)
    out = jnp.dot(wpm_ref[...], br.astype(wpm_ref.dtype),
                  preferred_element_type=jnp.float32)
    out = jnp.maximum(out + pbias_ref[...], 0.0)
    o_ref[...] = out.astype(o_ref.dtype)


# ------------------------------- glue (JAX) ----------------------------------

def _round_up(x, m):
    return (x + m - 1) // m * m


def _vmem_bytes(shape, dtype):
    """Rough VMEM footprint of one buffer with (8, 128) layout padding."""
    shape = tuple(shape)
    if len(shape) < 2:
        shape = (1,) * (2 - len(shape)) + shape
    *lead, s, l = shape
    n = 1
    for d in lead:
        n *= d
    return n * _round_up(max(s, 1), 8) * _round_up(max(l, 1), 128) * jnp.dtype(dtype).itemsize


def _vmem_capacity():
    try:
        return int(pltpu.get_tpu_info().vmem_capacity_bytes)
    except Exception:
        return 64 * 1024 * 1024          # conservative default (v7x per-core VMEM)


def fold_bn(gamma, beta, mean, var):
    scale = gamma / jnp.sqrt(var + EPS)
    bias = beta - mean * scale
    return scale, bias


def self_attention_mapping_forward(x_nchw, p, compute_dtype=jnp.float32,
                                   fused_taps=True, single_buffer_consts=True):
    """Pallas implementation of SelfAttention_Mapping.forward (eval mode).

    compute_dtype=jnp.bfloat16 is recommended on v5e/v6e/v7x (the kernel keeps f32
    accumulation); the self-test below uses f32 to hold the 1e-3 tolerance.
    """
    N, C, H, W = x_nchw.shape
    HW = H * W
    out_dtype = compute_dtype

    # ---- fold BN + build per-tap branch weights (compile-time constants under jit) ----
    s0, b0 = fold_bn(*p["bn0"])
    w0 = p["w0_conv"][:, :, 0, 0] * s0[:, None]                      # (C, C)
    tap_blocks = [jnp.zeros((9, C, C), jnp.float32).at[4].set(w0)]   # 1x1 == centre tap
    bias_blocks = [b0]
    for k in (1, 2, 3):                                              # all dilation 1
        sk, bk = fold_bn(*p[f"bn{k}"])
        wk = p[f"w{k}_conv"] * sk[:, None, None, None]               # (C, C, 3, 3) OIHW
        tap_blocks.append(jnp.transpose(wk, (2, 3, 0, 1)).reshape(9, C, C))
        bias_blocks.append(bk)
    w_taps = jnp.concatenate(tap_blocks, axis=1)                     # (9, 4C, C)
    b_branch = jnp.concatenate(bias_blocks).reshape(4 * C, 1)        # (4C, 1)

    sproj, bproj = fold_bn(*p["bnproj"])
    wproj = p["wproj_conv"][:, :, 0, 0] * sproj[:, None]             # (C, 5C)
    wproj_main = wproj[:, :4 * C]                                    # (C, 4C)
    wproj_pool = wproj[:, 4 * C:]                                    # (C, C)

    # ---- pooled branch: tiny per-batch math, folded into a projection bias ----
    sp, bp = fold_bn(*p["bnp"])
    wp = p["wp_conv"][:, :, 0, 0] * sp[:, None]                      # (C, C)
    gap = jnp.mean(x_nchw, axis=(2, 3))                              # (N, C)
    pooled = jnp.maximum(gap @ wp.T + bp[None, :], 0.0)              # (N, C)
    pbias = (pooled @ wproj_pool.T + bproj[None, :]).reshape(N, C, 1)

    vmem_cap = _vmem_capacity()

    if fused_taps:
        # --------------- primary path: taps built in VMEM, no im2col in HBM -----------
        P = _round_up(HW, 128)                       # lane-dense stores
        x_flat = x_nchw.astype(compute_dtype).reshape(N, C, HW)   # cast BEFORE kernel
        if P != HW:
            # Non-128-aligned H*W costs one extra output slice pass (see below).
            x_flat = jnp.pad(x_flat, ((0, 0), (0, 0), (0, P - HW)))

        w_taps_c = w_taps.astype(compute_dtype)
        wproj_main_c = wproj_main.astype(compute_dtype)

        wbuf = 1 if single_buffer_consts else 2
        est = (2 * _vmem_bytes((C, P), compute_dtype)             # input (double buffered)
               + 2 * _vmem_bytes((C, P), out_dtype)               # output (double buffered)
               + wbuf * (_vmem_bytes((9, 4 * C, C), compute_dtype)
                         + _vmem_bytes((4 * C, 1), jnp.float32)
                         + _vmem_bytes((C, 4 * C), compute_dtype))
               + 2 * _vmem_bytes((C, 1), jnp.float32)             # pbias
               + 2 * _vmem_bytes((4 * C, P), jnp.float32)         # acc + matmul result
               + 3 * _vmem_bytes((C, P), compute_dtype))          # shifted-tap temporaries
        if est > int(0.85 * vmem_cap):
            # TODO(synk): chunk the pixel axis inside the kernel for very large C*H*W.
            raise ValueError(f"fused-tap ASPP kernel needs ~{est >> 20} MiB VMEM "
                             f"(> {vmem_cap >> 20} MiB available)")
        vmem_limit = int(min(0.9 * vmem_cap, max(2 * est, 32 * 1024 * 1024)))

        spec_kwargs = dict(pipeline_mode=pl.Buffered(1)) if single_buffer_consts else {}
        kernel = functools.partial(_aspp_fused_taps_kernel, H=H, W=W)
        out = pl.pallas_call(
            kernel,
            out_shape=jax.ShapeDtypeStruct((N, C, P), out_dtype),
            grid=(N,),
            in_specs=[
                pl.BlockSpec((None, C, P), lambda n: (n, 0, 0)),
                pl.BlockSpec((9, 4 * C, C), lambda n: (0, 0, 0), **spec_kwargs),
                pl.BlockSpec((4 * C, 1), lambda n: (0, 0), **spec_kwargs),
                pl.BlockSpec((C, 4 * C), lambda n: (0, 0), **spec_kwargs),
                pl.BlockSpec((None, C, 1), lambda n: (n, 0, 0)),
            ],
            out_specs=pl.BlockSpec((None, C, P), lambda n: (n, 0, 0)),
            compiler_params=pltpu.CompilerParams(
                dimension_semantics=("parallel",),
                vmem_limit_bytes=vmem_limit),
        )(x_flat, w_taps_c, b_branch, wproj_main_c, pbias)

        if P != HW:
            out = out[:, :, :HW]
        return out.reshape(N, C, H, W)     # Dropout(0.5) is identity in eval

    # --------- compatibility path: wrapper-materialized im2col patches --------------
    w_branch = jnp.transpose(w_taps, (1, 0, 2)).reshape(4 * C, 9 * C).astype(compute_dtype)

    xc = x_nchw.astype(compute_dtype)                               # cast BEFORE im2col
    xp = jnp.pad(xc, ((0, 0), (0, 0), (1, 1), (1, 1)))
    taps = [xp[:, :, ky:ky + H, kx:kx + W] for ky in range(3) for kx in range(3)]
    patches = jnp.concatenate(taps, axis=1).reshape(N, 9 * C, HW)   # (N, 9C, HW)

    budget = 16 * 1024 * 1024
    bytes_per_px = 9 * C * jnp.dtype(compute_dtype).itemsize
    tile_cap = max(128, (budget // bytes_per_px) // 128 * 128)
    tile_p = int(min(2048, tile_cap, _round_up(HW, 128)))
    hw_pad = _round_up(HW, tile_p)
    if hw_pad != HW:
        patches = jnp.pad(patches, ((0, 0), (0, 0), (0, hw_pad - HW)))

    out = pl.pallas_call(
        _aspp_patches_kernel,
        out_shape=jax.ShapeDtypeStruct((N, C, hw_pad), out_dtype),
        grid=(N, hw_pad // tile_p),
        in_specs=[
            pl.BlockSpec((None, 9 * C, tile_p), lambda n, t: (n, 0, t)),
            pl.BlockSpec((4 * C, 9 * C), lambda n, t: (0, 0)),
            pl.BlockSpec((4 * C, 1), lambda n, t: (0, 0)),
            pl.BlockSpec((C, 4 * C), lambda n, t: (0, 0)),
            pl.BlockSpec((None, C, 1), lambda n, t: (n, 0, 0)),
        ],
        out_specs=pl.BlockSpec((None, C, tile_p), lambda n, t: (n, 0, t)),
        compiler_params=pltpu.CompilerParams(
            dimension_semantics=("parallel", "parallel")),
    )(patches, w_branch, b_branch, wproj_main.astype(compute_dtype), pbias)

    if hw_pad != HW:
        out = out[:, :, :HW]
    return out.reshape(N, C, H, W)


# ------------------------- synthetic params (PyTorch shapes) ------------------

def make_params(key, C):
    ks = jax.random.split(key, 32)
    i = 0

    def nxt():
        nonlocal i
        k = ks[i]
        i += 1
        return k

    def bn_params(c):
        g = 1.0 + 0.1 * jax.random.normal(nxt(), (c,), jnp.float32)
        b = 0.1 * jax.random.normal(nxt(), (c,), jnp.float32)
        m = 0.1 * jax.random.normal(nxt(), (c,), jnp.float32)
        v = 1.0 + 0.1 * jnp.abs(jax.random.normal(nxt(), (c,), jnp.float32))
        return g, b, m, v

    p = {}
    p["w0_conv"] = 0.2 * jax.random.normal(nxt(), (C, C, 1, 1), jnp.float32)
    p["bn0"] = bn_params(C)
    for k in range(1, 4):
        p[f"w{k}_conv"] = 0.2 * jax.random.normal(nxt(), (C, C, 3, 3), jnp.float32)
        p[f"bn{k}"] = bn_params(C)
    p["wp_conv"] = 0.2 * jax.random.normal(nxt(), (C, C, 1, 1), jnp.float32)
    p["bnp"] = bn_params(C)
    p["wproj_conv"] = 0.2 * jax.random.normal(nxt(), (C, 5 * C, 1, 1), jnp.float32)
    p["bnproj"] = bn_params(C)
    return p


# ---------------------------- pure-JAX reference ------------------------------

def _conv_nchw(x, w, dilation, padding):
    return jax.lax.conv_general_dilated(
        x, w, window_strides=(1, 1),
        padding=[(padding, padding), (padding, padding)],
        rhs_dilation=(dilation, dilation),
        dimension_numbers=("NCHW", "OIHW", "NCHW"),
        precision=jax.lax.Precision.HIGHEST)


def _bn_relu_nchw(y, bn):
    g, b, m, v = bn
    y = g[None, :, None, None] * (y - m[None, :, None, None]) / jnp.sqrt(
        v[None, :, None, None] + EPS) + b[None, :, None, None]
    return jnp.maximum(y, 0.0)


def reference_forward(x, p):
    res = [_bn_relu_nchw(_conv_nchw(x, p["w0_conv"], 1, 0), p["bn0"])]
    for k, d in zip((1, 2, 3), (1, 1, 1)):
        res.append(_bn_relu_nchw(_conv_nchw(x, p[f"w{k}_conv"], d, d), p[f"bn{k}"]))
    gap = jnp.mean(x, axis=(2, 3), keepdims=True)
    pooled = _bn_relu_nchw(_conv_nchw(gap, p["wp_conv"], 1, 0), p["bnp"])
    res.append(jnp.broadcast_to(pooled, x.shape))
    cat = jnp.concatenate(res, axis=1)
    return _bn_relu_nchw(_conv_nchw(cat, p["wproj_conv"], 1, 0), p["bnproj"])


# ----------------------------------- main -------------------------------------

if __name__ == "__main__":
    key = jax.random.PRNGKey(0)
    kx, kp = jax.random.split(key)

    N, C, H, W = 2, 8, 16, 16
    x = jax.random.normal(kx, (N, C, H, W), jnp.float32)
    params = make_params(kp, C)

    ref = jax.block_until_ready(reference_forward(x, params))

    # Preferred config first; the conservative fallbacks keep the script runnable on
    # jax/Mosaic versions that reject pl.Buffered(1) or the in-kernel lane rotation.
    configs = (
        dict(fused_taps=True, single_buffer_consts=True),
        dict(fused_taps=True, single_buffer_consts=False),
        dict(fused_taps=False, single_buffer_consts=False),
    )
    last_err = None
    for cfg in configs:
        try:
            fwd = jax.jit(functools.partial(
                self_attention_mapping_forward, p=params,
                compute_dtype=jnp.float32, **cfg))
            out = jax.block_until_ready(fwd(x))
            assert out.shape == (N, C, H, W), out.shape
            err = float(jnp.max(jnp.abs(out.astype(jnp.float32) - ref)))
            assert err < 1e-3, f"max abs err {err} (config {cfg})"
            break
        except Exception as e:   # robustness fallback
            last_err = e
    else:
        raise last_err

    print("KERNEL_OK")
</pallas_src>

<mosaic_0001>
module attributes {stable_mosaic.version = 11 : i64} {
  func.func @_aspp_patches_kernel(%arg0: i32, %arg1: i32, %arg2: memref<1x72x256xf32, #tpu.memory_space<vmem>>, %arg3: memref<32x72xf32, #tpu.memory_space<vmem>>, %arg4: memref<32x1xf32, #tpu.memory_space<vmem>>, %arg5: memref<8x32xf32, #tpu.memory_space<vmem>>, %arg6: memref<1x8x1xf32, #tpu.memory_space<vmem>>, %arg7: memref<1x8x256xf32, #tpu.memory_space<vmem>>) attributes {dimension_semantics = [#tpu.dimension_semantics<parallel>, #tpu.dimension_semantics<parallel>], iteration_bounds = array<i64: 2, 1>, scalar_prefetch = 0 : i64, scratch_operands = 0 : i64, tpu.core_type = #tpu.core_type<tc>, window_params = [{transform_indices = @transform_0, window_bounds = array<i64: 1, 72, 256>}, {pipeline_mode = #tpu.pipeline_mode<synchronous>, transform_indices = @transform_1, window_bounds = array<i64: 32, 72>}, {pipeline_mode = #tpu.pipeline_mode<synchronous>, transform_indices = @transform_2, window_bounds = array<i64: 32, 1>}, {pipeline_mode = #tpu.pipeline_mode<synchronous>, transform_indices = @transform_3, window_bounds = array<i64: 8, 32>}, {transform_indices = @transform_4, window_bounds = array<i64: 1, 8, 1>}, {transform_indices = @transform_5, window_bounds = array<i64: 1, 8, 256>}]} {
    %c0 = arith.constant 0 : index
    %c0_0 = arith.constant 0 : index
    %0 = vector.load %arg3[%c0, %c0_0] : memref<32x72xf32, #tpu.memory_space<vmem>>, vector<32x72xf32>
    %c0_1 = arith.constant 0 : index
    %c0_2 = arith.constant 0 : index
    %c0_3 = arith.constant 0 : index
    %1 = vector.load %arg2[%c0_1, %c0_2, %c0_3] : memref<1x72x256xf32, #tpu.memory_space<vmem>>, vector<1x72x256xf32>
    %2 = vector.shape_cast %1 : vector<1x72x256xf32> to vector<72x256xf32>
    %cst = arith.constant dense<0.000000e+00> : vector<32x256xf32>
    %3 = tpu.matmul %0, %2, %cst {dimension_numbers = #tpu.dot_dimension_numbers<[1], [0], [0], [1], [0, 0, 1, 1], [], []>} : vector<32x72xf32>, vector<72x256xf32>, vector<32x256xf32> -> vector<32x256xf32>
    %c0_4 = arith.constant 0 : index
    %c0_5 = arith.constant 0 : index
    %4 = vector.load %arg4[%c0_4, %c0_5] : memref<32x1xf32, #tpu.memory_space<vmem>>, vector<32x1xf32>
    %5 = vector.broadcast %4 : vector<32x1xf32> to vector<32x256xf32>
    %6 = arith.addf %3, %5 : vector<32x256xf32>
    %cst_6 = arith.constant 0.000000e+00 : f32
    %7 = vector.broadcast %cst_6 : f32 to vector<32x256xf32>
    %8 = arith.maximumf %6, %7 : vector<32x256xf32>
    %c0_7 = arith.constant 0 : index
    %c0_8 = arith.constant 0 : index
    %9 = vector.load %arg5[%c0_7, %c0_8] : memref<8x32xf32, #tpu.memory_space<vmem>>, vector<8x32xf32>
    %cst_9 = arith.constant dense<0.000000e+00> : vector<8x256xf32>
    %10 = tpu.matmul %9, %8, %cst_9 {dimension_numbers = #tpu.dot_dimension_numbers<[1], [0], [0], [1], [0, 0, 1, 1], [], []>} : vector<8x32xf32>, vector<32x256xf32>, vector<8x256xf32> -> vector<8x256xf32>
    %c0_10 = arith.constant 0 : index
    %c0_11 = arith.constant 0 : index
    %c0_12 = arith.constant 0 : index
    %11 = vector.load %arg6[%c0_10, %c0_11, %c0_12] : memref<1x8x1xf32, #tpu.memory_space<vmem>>, vector<1x8x1xf32>
    %12 = vector.shape_cast %11 : vector<1x8x1xf32> to vector<8x1xf32>
    %13 = vector.broadcast %12 : vector<8x1xf32> to vector<8x256xf32>
    %14 = arith.addf %10, %13 : vector<8x256xf32>
    %cst_13 = arith.constant 0.000000e+00 : f32
    %15 = vector.broadcast %cst_13 : f32 to vector<8x256xf32>
    %16 = arith.maximumf %14, %15 : vector<8x256xf32>
    %c0_14 = arith.constant 0 : index
    %c0_15 = arith.constant 0 : index
    %c0_16 = arith.constant 0 : index
    %17 = vector.load %arg7[%c0_14, %c0_15, %c0_16] : memref<1x8x256xf32, #tpu.memory_space<vmem>>, vector<1x8x256xf32>
    %18 = vector.shape_cast %17 : vector<1x8x256xf32> to vector<8x256xf32>
    %19 = vector.shape_cast %16 : vector<8x256xf32> to vector<1x8x256xf32>
    tpu.vector_store %arg7[%c0_14, %c0_15, %c0_16], %19 {strides = array<i32>} : memref<1x8x256xf32, #tpu.memory_space<vmem>>, vector<1x8x256xf32>,
    return
  }
  func.func @transform_0(%arg0: i32, %arg1: i32) -> (i32, i32, i32) {
    %c0_i32 = arith.constant 0 : i32
    %c0_i32_0 = arith.constant 0 : i32
    return %arg0, %c0_i32, %arg1 : i32, i32, i32
  }
  func.func @transform_1(%arg0: i32, %arg1: i32) -> (i32, i32) {
    %c0_i32 = arith.constant 0 : i32
    %c0_i32_0 = arith.constant 0 : i32
    %c0_i32_1 = arith.constant 0 : i32
    return %c0_i32, %c0_i32_0 : i32, i32
  }
  func.func @transform_2(%arg0: i32, %arg1: i32) -> (i32, i32) {
    %c0_i32 = arith.constant 0 : i32
    %c0_i32_0 = arith.constant 0 : i32
    %c0_i32_1 = arith.constant 0 : i32
    return %c0_i32, %c0_i32_0 : i32, i32
  }
  func.func @transform_3(%arg0: i32, %arg1: i32) -> (i32, i32) {
    %c0_i32 = arith.constant 0 : i32
    %c0_i32_0 = arith.constant 0 : i32
    %c0_i32_1 = arith.constant 0 : i32
    return %c0_i32, %c0_i32_0 : i32, i32
  }
  func.func @transform_4(%arg0: i32, %arg1: i32) -> (i32, i32, i32) {
    %c0_i32 = arith.constant 0 : i32
    %c0_i32_0 = arith.constant 0 : i32
    %c0_i32_1 = arith.constant 0 : i32
    return %arg0, %c0_i32, %c0_i32_0 : i32, i32, i32
  }
  func.func @transform_5(%arg0: i32, %arg1: i32) -> (i32, i32, i32) {
    %c0_i32 = arith.constant 0 : i32
    %c0_i32_0 = arith.constant 0 : i32
    return %arg0, %c0_i32, %arg1 : i32, i32, i32
  }
}

</mosaic_0001>

<bundles_post_ra>
// kernel: self_attention_mapping_forward.1
= control target key start
LH: loop header
LB: loop body
LE: loop exit
PB: predicated region body
PF: predicated region fallthrough
CT: control target
= control target key end

     0   :  { %s684_s18 = smov 0   ;;  %s686_s19 = smov 0   ;;  %s780_s0 = inlined_call_operand.vmem [shape: f32[2,72,256], index: 0, kind: input, shape index: {}]   ;;  %s781_s1 = inlined_call_operand.vmem [shape: f32[32,72], index: 1, kind: input, shape index: {}]   ;;  %s782_s2 = inlined_call_operand.vmem [shape: f32[32,1], index: 2, kind: input, shape index: {}]   ;;  %s783_s3 = inlined_call_operand.vmem [shape: f32[8,32], index: 3, kind: input, shape index: {}]   ;;  %s784_s4 = inlined_call_operand.vmem [shape: f32[2,8,1], index: 4, kind: input, shape index: {}]   ;;  %s785_s5 = inlined_call_operand.vmem [shape: f32[2,8,256], index: 5, kind: output, shape index: {}]  }
   0x1   :  { %s688_s20 = smov 0  }
   0x2 LB: > { %s27_s21 = sadd.s32 1, %s647_s19  ;;  %p564_p0 = scmp.ge.s32.totalorder %s651_s20, 1  ;;  %s651_s20 = sphi %s688_s20, %s15_s20   ;;  %s647_s19 = sphi %s686_s19, %s787_s19   ;;  %s643_s18 = sphi %s684_s18, %s786_s18  }
   0x3   : > { %p29_p1 = scmp.ge.s32.totalorder %s27_s21, 2  ;;  %p217_p2 = scmp.lt.s32.totalorder %s651_s20, 3 }
   0x5   : > { %s789_s21 = smov (%p29_p1, %s27_s21), 0  ;;  %p218_p3 = pnand %p564_p0, %p217_p2 }
   0x6   : > { %p258_p4 = scmp.lt.s32.totalorder (!%p218_p3), %s643_s18, 1 }
   0x7   : > { %221 = sbr.rel (%p218_p3) target bundleno = 323 (0x143), region = 40 }
   0xc   : > { %v304_v0 = vld [vmem:[%s782_s2 + $0x8] sm:$0xff]  ;;  %v653_v1 = vmov 0   ;;  %v306_v2 = vld [vmem:[%s782_s2 + $0x18] sm:$0xff]  ;;  %s791_s18 = smov (!%p258_p4, %s643_s18), 1  ;;  %v281_v21 = vld [vmem:[%s781_s1] sm:$0xff]  ;;  %vm327_vm0 = vcmask 588800  }
   0xd   : > { %627 = vset.pattern.permute.xlu1 %v653_v1  ;;  %626 = vset.pattern.permute.xlu0 %v653_v1  ;;  %s600_s26 = smul.u32 144, %s791_s18  ;;  %v284_v22 = vld [vmem:[%s781_s1 + $0x18] sm:$0xff]  ;;  %v303_v23 = vld [vmem:[%s782_s2] sm:$0xff]  ;;  %v305_v24 = vld [vmem:[%s782_s2 + $0x10] sm:$0xff]  ;;  %s566_s17 = sshll.u32 %s791_s18, 3  ;;  %vm413_vm1 = vcmask 261120  }
   0xe   : > { %314 = vperm.xlu1 %627, %v304_v0   ;;  %324 = vperm.xlu0 %626, %v306_v2   ;;  %v282_v25 = vld [vmem:[%s781_s1 + $0x8] sm:$0xff]  ;;  %v283_v26 = vld [vmem:[%s781_s1 + $0x10] sm:$0xff]  ;;  %s270_s24 = scalar_lea.vmem %s784_s4, %s566_s17  ;;  %v406_v55 = vld [vmem:[%s783_s3] sm:$0xff]  ;;  %s581_s27 = sshll.u32 %s791_s18, 4 }
   0xf   : > { %628 = vset.pattern.permute.xlu2 %v653_v1  ;;  %s714_s29 = scalar_lea.vmem %s780_s0, %s600_s26  ;;  %v407_v27 = vld [vmem:[%s270_s24] sm:$0xff]  ;;  %s279_s30 = scalar_lea.vmem %s785_s5, %s581_s27 }
  0x10   : > { %v301_v3 = vld [vmem:[%s714_s29 + $0x80] sm:$0xff]  ;;  %v302_v4 = vld [vmem:[%s714_s29 + $0x88] sm:$0xff]  ;;  %v299_v5 = vld [vmem:[%s714_s29 + $0x70] sm:$0xff]  ;;  %410 = vperm.xlu2 %628, %v407_v27  }
  0x11   : > { %347 = vmatpush.msra.mxu0 %v301_v3  ;;  %376 = vmatpush.msra.mxu1 %v302_v4  ;;  %v300_v6 = vld [vmem:[%s714_s29 + $0x78] sm:$0xff]  ;;  %v297_v7 = vld [vmem:[%s714_s29 + $0x60] sm:$0xff]  ;;  %v298_v8 = vld [vmem:[%s714_s29 + $0x68] sm:$0xff] }
  0x12   : > { %582 = vmatpush.msra.mxu2 %v301_v3  ;;  %591 = vmatpush.msra.mxu3 %v302_v4  ;;  %v295_v9 = vld [vmem:[%s714_s29 + $0x50] sm:$0xff]  ;;  %v296_v10 = vld [vmem:[%s714_s29 + $0x58] sm:$0xff]  ;;  %v293_v11 = vld [vmem:[%s714_s29 + $0x40] sm:$0xff] }
  0x13   : > { %348 = vmatpush.msra.mxu0 %v299_v5  ;;  %377 = vmatpush.msra.mxu1 %v300_v6  ;;  %v294_v12 = vld [vmem:[%s714_s29 + $0x48] sm:$0xff]  ;;  %v291_v13 = vld [vmem:[%s714_s29 + $0x30] sm:$0xff]  ;;  %v292_v14 = vld [vmem:[%s714_s29 + $0x38] sm:$0xff] }
  0x14   : > { %583 = vmatpush.msra.mxu2 %v299_v5  ;;  %592 = vmatpush.msra.mxu3 %v300_v6  ;;  %v289_v15 = vld [vmem:[%s714_s29 + $0x20] sm:$0xff]  ;;  %v290_v16 = vld [vmem:[%s714_s29 + $0x28] sm:$0xff]  ;;  %v287_v17 = vld [vmem:[%s714_s29 + $0x10] sm:$0xff] }
  0x15   : > { %349 = vmatpush.msra.mxu0 %v297_v7  ;;  %378 = vmatpush.msra.mxu1 %v298_v8  ;;  %v288_v18 = vld [vmem:[%s714_s29 + $0x18] sm:$0xff]  ;;  %v285_v19 = vld [vmem:[%s714_s29] sm:$0xff]  ;;  %v286_v20 = vld [vmem:[%s714_s29 + $0x8] sm:$0xff] }
  0x16   : > { %584 = vmatpush.msra.mxu2 %v297_v7  ;;  %593 = vmatpush.msra.mxu3 %v298_v8 }
  0x17   : > { %350 = vmatpush.msra.mxu0 %v295_v9  ;;  %379 = vmatpush.msra.mxu1 %v296_v10 }
  0x18   : > { %585 = vmatpush.msra.mxu2 %v295_v9  ;;  %594 = vmatpush.msra.mxu3 %v296_v10 }
  0x19   : > { %351 = vmatpush.msra.mxu0 %v293_v11  ;;  %380 = vmatpush.msra.mxu1 %v294_v12 }
  0x1a   : > { %586 = vmatpush.msra.mxu2 %v293_v11  ;;  %595 = vmatpush.msra.mxu3 %v294_v12 }
  0x1b   : > { %352 = vmatpush.msra.mxu0 %v291_v13  ;;  %381 = vmatpush.msra.mxu1 %v292_v14 }
  0x1c   : > { %587 = vmatpush.msra.mxu2 %v291_v13  ;;  %596 = vmatpush.msra.mxu3 %v292_v14 }
  0x1d   : > { %353 = vmatpush.msra.mxu0 %v289_v15  ;;  %382 = vmatpush.msra.mxu1 %v290_v16 }
  0x1e   : > { %588 = vmatpush.msra.mxu2 %v289_v15  ;;  %597 = vmatpush.msra.mxu3 %v290_v16 }
  0x1f   : > { %354 = vmatpush.msra.mxu0 %v287_v17  ;;  %383 = vmatpush.msra.mxu1 %v288_v18 }
  0x20   : > { %589 = vmatpush.msra.mxu2 %v287_v17  ;;  %598 = vmatpush.msra.mxu3 %v288_v18 }
  0x21   : > { %355 = vmatpush.msra.mxu0 %v285_v19  ;;  %384 = vmatpush.msra.mxu1 %v286_v20 }
  0x22   : > { %569 = vmatmul.msk.f32.vlgmr.msra.gmra.mxu0 %vm327_vm0, %v281_v21  ;;  %573 = vmatmul.msk.f32.vlgmr.msra.gmra.mxu1 %vm327_vm0, %v281_v21 }
  0x23   : > { %590 = vmatpush.msra.mxu2 %v285_v19  ;;  %599 = vmatpush.msra.mxu3 %v286_v20 }
  0x24   : > { %572 = vmatmul.msk.f32.vlgmr.msra.gmra.mxu2 %vm327_vm0, %v284_v22  ;;  %576 = vmatmul.msk.f32.vlgmr.msra.gmra.mxu3 %vm327_vm0, %v284_v22 }
  0x25   : > { %309 = vperm.xlu1 %627, %v303_v23   ;;  %319 = vperm.xlu0 %626, %v305_v24  }
  0x2a   : > { %570 = vmatmul.msk.f32.gmra.mxu0 %vm327_vm0, %v282_v25  ;;  %574 = vmatmul.msk.f32.gmra.mxu1 %vm327_vm0, %v282_v25 }
  0x32   : > { %571 = vmatmul.msk.f32.gmra.mxu0 %vm327_vm0, %v283_v26  ;;  %575 = vmatmul.msk.f32.gmra.mxu1 %vm327_vm0, %v283_v26 }
  0x6a   : > { %v411_v57 = vpop.permute.xlu2 %410 }
  0x80   : > { %v315_v30 = vpop.permute.xlu1 %314  ;;  %v325_v31 = vpop.permute.xlu0 %324 }
  0x97   : > { %v310_v40 = vpop.permute.xlu1 %309  ;;  %v320_v41 = vpop.permute.xlu0 %319 }
  0x9f   : > { %v357_v28 = vpop.f32.mrf.mxu0  ;;  %v386_v29 = vpop.f32.mrf.mxu1 }
  0xa0   : > { %v358_v48 = vadd.f32 %v357_v28, %v310_v40  ;;  %v387_v50 = vadd.f32 %v386_v29, %v310_v40 }
  0xa2   : > { %v398_v54 = vmax.f32 %v358_v48, 0.0  ;;  %v399_v56 = vmax.f32 %v387_v50, 0.0 }
  0xa7   : > { %v360_v32 = vpop.f32.mrf.mxu0  ;;  %v366_v33 = vpop.f32.mrf.mxu2 }
  0xa8   : > { %v367_v34 = vadd.f32 %v366_v33, %v325_v31  ;;  %v389_v35 = vpop.f32.mrf.mxu1  ;;  %v395_v36 = vpop.f32.mrf.mxu3  ;;  %v361_v43 = vadd.f32 %v360_v32, %v315_v30 }
  0xa9   : > { %v396_v37 = vadd.f32 %v395_v36, %v325_v31  ;;  %v390_v46 = vadd.f32 %v389_v35, %v315_v30 }
  0xaa   : > { %v404_v38 = vmax.f32 %v367_v34, 0.0  ;;  %v400_v52 = vmax.f32 %v361_v43, 0.0 }
  0xab   : > { %v405_v39 = vmax.f32 %v396_v37, 0.0  ;;  %v401_v53 = vmax.f32 %v390_v46, 0.0 }
  0xac   : > { %429 = vmatpush.msrb.mxu2 %v404_v38 }
  0xad   : > { %449 = vmatpush.msrb.mxu3 %v405_v39 }
  0xaf   : > { %v363_v42 = vpop.f32.mrf.mxu0 }
  0xb0   : > { %v364_v44 = vadd.f32 %v363_v42, %v320_v41  ;;  %v392_v45 = vpop.f32.mrf.mxu1 }
  0xb1   : > { %v393_v47 = vadd.f32 %v392_v45, %v320_v41 }
  0xb2   : > { %v402_v49 = vmax.f32 %v364_v44, 0.0 }
  0xb3   : > { %v403_v51 = vmax.f32 %v393_v47, 0.0 }
  0xb4   : > { %430 = vmatpush.msrb.mxu2 %v402_v49 }
  0xb5   : > { %450 = vmatpush.msrb.mxu3 %v403_v51 }
  0xb6   : > { %431 = vmatpush.msrb.mxu2 %v400_v52 }
  0xb7   : > { %451 = vmatpush.msrb.mxu3 %v401_v53 }
  0xb8   : > { %432 = vmatpush.msrb.mxu2 %v398_v54 }
  0xb9   : > { %452 = vmatpush.msrb.mxu3 %v399_v56  ;;  %577 = vmatmul.msk.f32.vlgmr.msrb.gmra.mxu2 %vm413_vm1, %v406_v55 }
  0xba   : > { %578 = vmatmul.msk.f32.vlgmr.msrb.gmra.mxu3 %vm413_vm1, %v406_v55 }
 0x13c   : > { %v434_v58 = vpop.f32.mrf.mxu2 }
 0x13d   : > { %v435_v59 = vadd.f32 %v434_v58, %v411_v57  ;;  %v454_v60 = vpop.f32.mrf.mxu3 }
 0x13e   : > { %v455_v61 = vadd.f32 %v454_v60, %v411_v57 }
 0x13f   : > { %v457_v62 = vmax.f32 %v435_v59, 0.0 }
 0x140   : > { %v458_v63 = vmax.f32 %v455_v61, 0.0 }
 0x141   : > { %459 = vst [vmem:[%s279_s30] sm:$0xff] %v457_v62 }
 0x142   : > { %460 = vst [vmem:[%s279_s30 + $0x8] sm:$0xff] %v458_v63 }
 0x143 PF: > { %s15_s20 = sadd.s32 1, %s651_s20   ;;  %s786_s18 = smov %s647_s19 }
 0x144   : > { %p12_p5 = scmp.ge.s32.totalorder %s15_s20, 4   ;;  %s787_s19 = smov %s789_s21 }
 0x146   :  { %14 = sbr.rel (!%p12_p5) target bundleno = 2 (0x2), region = 73 }

</bundles_post_ra>
